<compile_context>
chip_gen: v6e
topology: v6e:2x2x1
jax: 0.10.0
libtpu: 0.0.40
codegen_flags: <defaults>
</compile_context>

<pallas_src>
import functools

import jax
import jax.numpy as jnp
from jax.experimental import pallas as pl
from jax.experimental.pallas import tpu as pltpu

IN_F, HID_F, OUT_F = 2, 10, 3
HID_PAD = 128                                  # hidden dim padded to one lane tile
DROP_P = 0.5
_KEEP_PROB = 1.0 - DROP_P
KEEP_THRESHOLD = min(int(_KEEP_PROB * (1 << 32)), (1 << 32) - 1)   # uint32 compare
KEEP_SCALE = 1.0 / _KEEP_PROB


def _round_up(n, m):
    return ((n + m - 1) // m) * m


def _mlp_dropout_kernel(seed_ref,                                   # scalar prefetch (SMEM)
                        x_ref, w1_ref, b1_ref, w2_ref, b2_ref,       # VMEM inputs
                        o_ref,                                       # VMEM output (TB, OUT_F)
                        *, training, block_rows):
    # ---- layer 1: x @ W1 + b1, ReLU.  K=2 -> two VPU broadcast FMAs, skip MXU ----
    x = x_ref[...]                               # (TB, 2)  unpadded features
    w1 = w1_ref[...]                             # (2, HID_PAD)
    y = x[:, 0:1] * w1[0:1, :] + x[:, 1:2] * w1[1:2, :]
    y = y + b1_ref[...]                          # (1, HID_PAD) broadcast over batch
    y = jnp.maximum(y, 0.0)

    # ---- dropout(p=DROP_P), inverted scaling (training only) ----
    if training:
        # counter-based hash PRNG keyed on (seed, global row, col): decorrelated
        # across batch tiles, deterministic for a given seed, plain int32/uint32
        # VPU ops (works both compiled and in TPU-interpret mode).
        row0 = (pl.program_id(0) * block_rows).astype(jnp.uint32)
        rows = jax.lax.broadcasted_iota(jnp.uint32, y.shape, 0) + row0
        cols = jax.lax.broadcasted_iota(jnp.uint32, y.shape, 1)
        v = rows * jnp.uint32(0x9E3779B1) + cols * jnp.uint32(0x85EBCA77)
        v = v ^ (seed_ref[0].astype(jnp.uint32) * jnp.uint32(0xC2B2AE3D))
        v = v ^ (v >> 16)
        v = v * jnp.uint32(0x7FEB352D)
        v = v ^ (v >> 15)
        v = v * jnp.uint32(0x846CA68B)
        v = v ^ (v >> 16)
        keep = v < jnp.uint32(KEEP_THRESHOLD)    # P(keep) = 1 - DROP_P (p-general)
        y = jnp.where(keep, y * jnp.float32(KEEP_SCALE), 0.0)

    # ---- layer 2: narrow-N MXU dot (TB, HID_PAD) @ (HID_PAD, OUT_F) -> (TB, OUT_F)
    # W2 is padded only on K (rows >= HID_F are zero), so no post-dot slice needed.
    z = jnp.dot(y, w2_ref[...], preferred_element_type=jnp.float32)
    o_ref[...] = (z + b2_ref[...]).astype(o_ref.dtype)


def prepare_params(params):
    """One-time padding of constant weights/biases (hoisted out of the hot path).

    self.bias1 / self.bias2 in the torch module are zeros -> no-op adds, dropped.
    """
    w1_p = jnp.zeros((IN_F, HID_PAD), jnp.float32).at[:, :HID_F].set(params["w1"])
    b1_p = jnp.zeros((1, HID_PAD), jnp.float32).at[0, :HID_F].set(params["b1"])
    w2_p = jnp.zeros((HID_PAD, OUT_F), jnp.float32).at[:HID_F, :].set(params["w2"])
    b2_p = params["b2"].reshape(1, OUT_F).astype(jnp.float32)
    return {"w1": w1_p, "b1": b1_p, "w2": w2_p, "b2": b2_p}


def model_dropout_forward(x, prepared, *, seed=0, training=True, block_rows=512):
    """x: (B, 2) float32.  `prepared` from prepare_params().  Returns (B, 3) f32."""
    x = x.astype(jnp.float32)
    B = x.shape[0]
    # batch tile: multiple of 8 sublanes, capped (512 keeps v7x VMEM headroom).
    TB = min(block_rows, _round_up(B, 8))
    B_pad = _round_up(B, TB)
    if B_pad != B:
        x = jnp.zeros((B_pad, IN_F), jnp.float32).at[:B].set(x)

    seed_arr = jnp.asarray([seed], dtype=jnp.int32)
    kernel = functools.partial(_mlp_dropout_kernel,
                               training=training, block_rows=TB)

    out = pl.pallas_call(
        kernel,
        out_shape=jax.ShapeDtypeStruct((B_pad, OUT_F), jnp.float32),
        grid_spec=pltpu.PrefetchScalarGridSpec(
            num_scalar_prefetch=1,
            grid=(B_pad // TB,),
            in_specs=[
                pl.BlockSpec((TB, IN_F), lambda i, s: (i, 0)),         # x (batch-tiled)
                pl.BlockSpec((IN_F, HID_PAD), lambda i, s: (0, 0)),    # w1 (resident)
                pl.BlockSpec((1, HID_PAD), lambda i, s: (0, 0)),       # b1 (resident)
                pl.BlockSpec((HID_PAD, OUT_F), lambda i, s: (0, 0)),   # w2 (resident, K-padded only)
                pl.BlockSpec((1, OUT_F), lambda i, s: (0, 0)),         # b2 (resident)
            ],
            out_specs=pl.BlockSpec((TB, OUT_F), lambda i, s: (i, 0)),  # narrow output
        ),
        compiler_params=pltpu.CompilerParams(
            dimension_semantics=("parallel",)),                        # megacore on v7x
    )(seed_arr, x, prepared["w1"], prepared["b1"], prepared["w2"], prepared["b2"])

    return out[:B] if B_pad != B else out


def init_params(key):
    """Deterministic init; shapes follow nn.Linear(2,10) / nn.Linear(10,3),
    stored as (in_features, out_features) so the kernel does x @ W."""
    k1, k2, k3, k4 = jax.random.split(key, 4)
    lim1 = 1.0 / jnp.sqrt(float(IN_F))
    lim2 = 1.0 / jnp.sqrt(float(HID_F))
    w1 = jax.random.uniform(k1, (IN_F, HID_F), jnp.float32, -lim1, lim1)
    b1 = jax.random.uniform(k2, (HID_F,), jnp.float32, -lim1, lim1)
    w2 = jax.random.uniform(k3, (HID_F, OUT_F), jnp.float32, -lim2, lim2)
    b2 = jax.random.uniform(k4, (OUT_F,), jnp.float32, -lim2, lim2)
    return {"w1": w1, "b1": b1, "w2": w2, "b2": b2}


if __name__ == "__main__":
    key = jax.random.PRNGKey(0)
    pkey, xkey = jax.random.split(key)
    params = init_params(pkey)
    prepared = prepare_params(params)     # one-time constant padding (hoisted)

    B = 8
    x = jax.random.normal(xkey, (B, IN_F), jnp.float32)

    # training path (dropout active)
    out = jax.block_until_ready(
        model_dropout_forward(x, prepared, seed=0, training=True))
    assert out.shape == (B, OUT_F)
    assert bool(jnp.all(jnp.isfinite(out)))

    # eval path (dropout = identity) must match the plain-JAX reference exactly
    out_eval = jax.block_until_ready(
        model_dropout_forward(x, prepared, training=False))
    ref_eval = (jnp.maximum(x @ params["w1"] + params["b1"], 0.0)
                @ params["w2"] + params["b2"])
    assert jnp.allclose(out_eval, ref_eval, atol=1e-5, rtol=1e-5)

    print("KERNEL_OK")
</pallas_src>

<mosaic_0001>
module attributes {stable_mosaic.version = 11 : i64} {
  func.func @_mlp_dropout_kernel(%arg0: i32, %arg1: memref<1xi32, #tpu.memory_space<smem>>, %arg2: memref<8x2xf32, #tpu.memory_space<vmem>>, %arg3: memref<2x128xf32, #tpu.memory_space<vmem>>, %arg4: memref<1x128xf32, #tpu.memory_space<vmem>>, %arg5: memref<128x3xf32, #tpu.memory_space<vmem>>, %arg6: memref<1x3xf32, #tpu.memory_space<vmem>>, %arg7: memref<8x3xf32, #tpu.memory_space<vmem>>) attributes {dimension_semantics = [#tpu.dimension_semantics<parallel>], iteration_bounds = array<i64: 1>, scalar_prefetch = 1 : i64, scratch_operands = 0 : i64, tpu.core_type = #tpu.core_type<tc>, window_params = [{transform_indices = @transform_0, window_bounds = array<i64: 8, 2>}, {pipeline_mode = #tpu.pipeline_mode<synchronous>, transform_indices = @transform_1, window_bounds = array<i64: 2, 128>}, {pipeline_mode = #tpu.pipeline_mode<synchronous>, transform_indices = @transform_2, window_bounds = array<i64: 1, 128>}, {pipeline_mode = #tpu.pipeline_mode<synchronous>, transform_indices = @transform_3, window_bounds = array<i64: 128, 3>}, {pipeline_mode = #tpu.pipeline_mode<synchronous>, transform_indices = @transform_4, window_bounds = array<i64: 1, 3>}, {transform_indices = @transform_5, window_bounds = array<i64: 8, 3>}]} {
    %c0 = arith.constant 0 : index
    %c0_0 = arith.constant 0 : index
    %0 = vector.load %arg2[%c0, %c0_0] : memref<8x2xf32, #tpu.memory_space<vmem>>, vector<8x2xf32>
    %c0_1 = arith.constant 0 : index
    %c0_2 = arith.constant 0 : index
    %1 = vector.load %arg3[%c0_1, %c0_2] : memref<2x128xf32, #tpu.memory_space<vmem>>, vector<2x128xf32>
    %2 = vector.extract_strided_slice %0 {offsets = [0, 0], sizes = [8, 1], strides = [1, 1]} : vector<8x2xf32> to vector<8x1xf32>
    %3 = vector.extract_strided_slice %1 {offsets = [0, 0], sizes = [1, 128], strides = [1, 1]} : vector<2x128xf32> to vector<1x128xf32>
    %4 = vector.broadcast %2 : vector<8x1xf32> to vector<8x128xf32>
    %5 = vector.broadcast %3 : vector<1x128xf32> to vector<8x128xf32>
    %6 = arith.mulf %4, %5 : vector<8x128xf32>
    %7 = vector.extract_strided_slice %0 {offsets = [0, 1], sizes = [8, 1], strides = [1, 1]} : vector<8x2xf32> to vector<8x1xf32>
    %8 = vector.extract_strided_slice %1 {offsets = [1, 0], sizes = [1, 128], strides = [1, 1]} : vector<2x128xf32> to vector<1x128xf32>
    %9 = vector.broadcast %7 : vector<8x1xf32> to vector<8x128xf32>
    %10 = vector.broadcast %8 : vector<1x128xf32> to vector<8x128xf32>
    %11 = arith.mulf %9, %10 : vector<8x128xf32>
    %12 = arith.addf %6, %11 : vector<8x128xf32>
    %c0_3 = arith.constant 0 : index
    %c0_4 = arith.constant 0 : index
    %13 = vector.load %arg4[%c0_3, %c0_4] : memref<1x128xf32, #tpu.memory_space<vmem>>, vector<1x128xf32>
    %14 = vector.broadcast %13 : vector<1x128xf32> to vector<8x128xf32>
    %15 = arith.addf %12, %14 : vector<8x128xf32>
    %cst = arith.constant 0.000000e+00 : f32
    %16 = vector.broadcast %cst : f32 to vector<8x128xf32>
    %17 = arith.maximumf %15, %16 : vector<8x128xf32>
    %c8_i32 = arith.constant 8 : i32
    %18 = arith.muli %arg0, %c8_i32 : i32
    %19 = tpu.iota {dimensions = array<i32: 0>} : vector<8x128xi32>
    %20 = vector.broadcast %18 : i32 to vector<8x128xi32>
    %21 = arith.addi %19, %20 : vector<8x128xi32>
    %22 = tpu.iota {dimensions = array<i32: 1>} : vector<8x128xi32>
    %c-1640531535_i32 = arith.constant -1640531535 : i32
    %23 = vector.broadcast %c-1640531535_i32 : i32 to vector<8x128xi32>
    %24 = arith.muli %21, %23 : vector<8x128xi32>
    %c-2048144777_i32 = arith.constant -2048144777 : i32
    %25 = vector.broadcast %c-2048144777_i32 : i32 to vector<8x128xi32>
    %26 = arith.muli %22, %25 : vector<8x128xi32>
    %27 = arith.addi %24, %26 : vector<8x128xi32>
    %c0_5 = arith.constant 0 : index
    %28 = memref.load %arg1[%c0_5] : memref<1xi32, #tpu.memory_space<smem>>
    %c-1028477379_i32 = arith.constant -1028477379 : i32
    %29 = arith.muli %28, %c-1028477379_i32 : i32
    %30 = vector.broadcast %29 : i32 to vector<8x128xi32>
    %31 = arith.xori %27, %30 : vector<8x128xi32>
    %c16_i32 = arith.constant 16 : i32
    %32 = vector.broadcast %c16_i32 : i32 to vector<8x128xi32>
    %33 = arith.shrui %31, %32 : vector<8x128xi32>
    %34 = arith.xori %31, %33 : vector<8x128xi32>
    %c2146121005_i32 = arith.constant 2146121005 : i32
    %35 = vector.broadcast %c2146121005_i32 : i32 to vector<8x128xi32>
    %36 = arith.muli %34, %35 : vector<8x128xi32>
    %c15_i32 = arith.constant 15 : i32
    %37 = vector.broadcast %c15_i32 : i32 to vector<8x128xi32>
    %38 = arith.shrui %36, %37 : vector<8x128xi32>
    %39 = arith.xori %36, %38 : vector<8x128xi32>
    %c-2073254261_i32 = arith.constant -2073254261 : i32
    %40 = vector.broadcast %c-2073254261_i32 : i32 to vector<8x128xi32>
    %41 = arith.muli %39, %40 : vector<8x128xi32>
    %c16_i32_6 = arith.constant 16 : i32
    %42 = vector.broadcast %c16_i32_6 : i32 to vector<8x128xi32>
    %43 = arith.shrui %41, %42 : vector<8x128xi32>
    %44 = arith.xori %41, %43 : vector<8x128xi32>
    %c-2147483648_i32 = arith.constant -2147483648 : i32
    %45 = vector.broadcast %c-2147483648_i32 : i32 to vector<8x128xi32>
    %46 = arith.cmpi ult, %44, %45 : vector<8x128xi32>
    %cst_7 = arith.constant 2.000000e+00 : f32
    %47 = vector.broadcast %cst_7 : f32 to vector<8x128xf32>
    %48 = arith.mulf %17, %47 : vector<8x128xf32>
    %cst_8 = arith.constant 0.000000e+00 : f32
    %49 = vector.broadcast %cst_8 : f32 to vector<8x128xf32>
    %50 = arith.select %46, %48, %49 : vector<8x128xi1>, vector<8x128xf32>
    %c0_9 = arith.constant 0 : index
    %c0_10 = arith.constant 0 : index
    %51 = vector.load %arg5[%c0_9, %c0_10] : memref<128x3xf32, #tpu.memory_space<vmem>>, vector<128x3xf32>
    %cst_11 = arith.constant dense<0.000000e+00> : vector<8x3xf32>
    %52 = tpu.matmul %50, %51, %cst_11 {dimension_numbers = #tpu.dot_dimension_numbers<[1], [0], [0], [1], [0, 0, 1, 1], [], []>} : vector<8x128xf32>, vector<128x3xf32>, vector<8x3xf32> -> vector<8x3xf32>
    %c0_12 = arith.constant 0 : index
    %c0_13 = arith.constant 0 : index
    %53 = vector.load %arg6[%c0_12, %c0_13] : memref<1x3xf32, #tpu.memory_space<vmem>>, vector<1x3xf32>
    %54 = vector.broadcast %53 : vector<1x3xf32> to vector<8x3xf32>
    %55 = arith.addf %52, %54 : vector<8x3xf32>
    %c0_14 = arith.constant 0 : index
    %c0_15 = arith.constant 0 : index
    %56 = vector.load %arg7[%c0_14, %c0_15] : memref<8x3xf32, #tpu.memory_space<vmem>>, vector<8x3xf32>
    tpu.vector_store %arg7[%c0_14, %c0_15], %55 {strides = array<i32>} : memref<8x3xf32, #tpu.memory_space<vmem>>, vector<8x3xf32>,
    return
  }
  func.func @transform_0(%arg0: i32, %arg1: memref<1xi32, #tpu.memory_space<smem>>) -> (i32, i32) {
    %c0_i32 = arith.constant 0 : i32
    %c0_i32_0 = arith.constant 0 : i32
    return %arg0, %c0_i32 : i32, i32
  }
  func.func @transform_1(%arg0: i32, %arg1: memref<1xi32, #tpu.memory_space<smem>>) -> (i32, i32) {
    %c0_i32 = arith.constant 0 : i32
    %c0_i32_0 = arith.constant 0 : i32
    %c0_i32_1 = arith.constant 0 : i32
    return %c0_i32, %c0_i32_0 : i32, i32
  }
  func.func @transform_2(%arg0: i32, %arg1: memref<1xi32, #tpu.memory_space<smem>>) -> (i32, i32) {
    %c0_i32 = arith.constant 0 : i32
    %c0_i32_0 = arith.constant 0 : i32
    %c0_i32_1 = arith.constant 0 : i32
    return %c0_i32, %c0_i32_0 : i32, i32
  }
  func.func @transform_3(%arg0: i32, %arg1: memref<1xi32, #tpu.memory_space<smem>>) -> (i32, i32) {
    %c0_i32 = arith.constant 0 : i32
    %c0_i32_0 = arith.constant 0 : i32
    %c0_i32_1 = arith.constant 0 : i32
    return %c0_i32, %c0_i32_0 : i32, i32
  }
  func.func @transform_4(%arg0: i32, %arg1: memref<1xi32, #tpu.memory_space<smem>>) -> (i32, i32) {
    %c0_i32 = arith.constant 0 : i32
    %c0_i32_0 = arith.constant 0 : i32
    %c0_i32_1 = arith.constant 0 : i32
    return %c0_i32, %c0_i32_0 : i32, i32
  }
  func.func @transform_5(%arg0: i32, %arg1: memref<1xi32, #tpu.memory_space<smem>>) -> (i32, i32) {
    %c0_i32 = arith.constant 0 : i32
    %c0_i32_0 = arith.constant 0 : i32
    return %arg0, %c0_i32 : i32, i32
  }
}

</mosaic_0001>

<bundles_post_ra>
// kernel: tpu_custom_call.1
= control target key start
LH: loop header
LB: loop body
LE: loop exit
PB: predicated region body
PF: predicated region fallthrough
CT: control target
= control target key end

     0   :  { %v238_v0 = vmov 0   ;;  %v239_v2 = vmov 0.0   ;;  %v240_v7 = vmov 1   ;;  %vm241_vm0 = vmmov 0   ;;  %s343_s1 = inlined_call_operand.vmem [shape: f32[8,2], index: 1, kind: input, shape index: {}]   ;;  %s344_s4 = inlined_call_operand.vmem [shape: f32[128,3], index: 4, kind: input, shape index: {}]   ;;  %s345_s0 = inlined_call_operand.<no memory space> [shape: s32[1], index: 0, kind: input, shape index: {}]   ;;  %s346_s2 = inlined_call_operand.vmem [shape: f32[2,128], index: 2, kind: input, shape index: {}]   ;;  %s347_s3 = inlined_call_operand.vmem [shape: f32[1,128], index: 3, kind: input, shape index: {}]   ;;  %s348_s5 = inlined_call_operand.vmem [shape: f32[1,3], index: 5, kind: input, shape index: {}]   ;;  %s349_s6 = inlined_call_operand.vmem [shape: f32[8,3], index: 6, kind: output, shape index: {}]  }
   0x1   :  { %236 = vset.pattern.permute.xlu0 %v238_v0  ;;  %v22_v1 = vld [vmem:[%s343_s1] sm:$0xff]  ;;  %197 = vmatprep.subr.mxu0 %v239_v2  ;;  %v93_v3 = vld [vmem:[%s344_s4 + $0x78] sm:$0xff]  ;;  %v92_v4 = vld [vmem:[%s344_s4 + $0x70] sm:$0xff]  ;;  %v29_v20 = vlaneseq  ;;  %s64_s7 = smul.u32 3266489917, %s345_s0  ;;  %vm171_vm2 = vcmask 23552  }
   0x2   :  { %26 = vperm.xlu0 %236, %v22_v1   ;;  %198 = vmatpush3.msra.mxu0 %v93_v3  ;;  %v91_v5 = vld [vmem:[%s344_s4 + $0x68] sm:$0xff]  ;;  %v90_v6 = vld [vmem:[%s344_s4 + $0x60] sm:$0xff]  ;;  %v89_v8 = vld [vmem:[%s344_s4 + $0x58] sm:$0xff] }
   0x3   :  { %199 = vmatprep.subr.mxu0 %v239_v2  ;;  %v88_v9 = vld [vmem:[%s344_s4 + $0x50] sm:$0xff]  ;;  %v87_v10 = vld [vmem:[%s344_s4 + $0x48] sm:$0xff]  ;;  %229 = vmatprep.mubr.msk.f32.mxu0 %vm241_vm0, %v239_v2  ;;  %v86_v11 = vld [vmem:[%s344_s4 + $0x40] sm:$0xff]  ;;  %v30_v21 = vshrl.u32 %v29_v20, 7  ;;  %v59_v22 = vand.u32 127, %v29_v20  ;;  %v65_v26 = vstv %s64_s7 }
   0x4   :  { %200 = vmatpush3.msra.mxu0 %v92_v4  ;;  %v85_v12 = vld [vmem:[%s344_s4 + $0x38] sm:$0xff]  ;;  %v84_v13 = vld [vmem:[%s344_s4 + $0x30] sm:$0xff]  ;;  %v83_v14 = vld [vmem:[%s344_s4 + $0x28] sm:$0xff] }
   0x5   :  { %201 = vmatprep.subr.mxu0 %v239_v2  ;;  %v82_v15 = vld [vmem:[%s344_s4 + $0x20] sm:$0xff]  ;;  %v81_v16 = vld [vmem:[%s344_s4 + $0x18] sm:$0xff]  ;;  %v80_v17 = vld [vmem:[%s344_s4 + $0x10] sm:$0xff]  ;;  %v60_v23 = vmul.u32 2654435761, %v30_v21  ;;  %v31_v33 = vsub.s32 0, %v30_v21 }
   0x6   :  { %237 = vset.pattern.permute.xlu0 %v240_v7  ;;  %202 = vmatpush3.msra.mxu0 %v91_v5  ;;  %v79_v18 = vld [vmem:[%s344_s4 + $0x8] sm:$0xff]  ;;  %v78_v19 = vld [vmem:[%s344_s4] sm:$0xff]  ;;  %v61_v24 = vmul.u32 2246822519, %v59_v22  ;;  %v40_v34 = vsub.s32 1, %v30_v21 }
   0x7   :  { %35 = vperm.xlu0 %237, %v22_v1   ;;  %203 = vmatprep.subr.mxu0 %v239_v2  ;;  %v23_v35 = vld [vmem:[%s346_s2] sm:$0x3] }
   0x8   :  { %204 = vmatpush3.msra.mxu0 %v90_v6  ;;  %v62_v25 = vadd.s32 %v61_v24, %v60_v23  ;;  %v32_v38 = vrot.slane %v23_v35, %v31_v33  ;;  %v41_v39 = vrot.slane %v23_v35, %v40_v34  ;;  %v177_v44 = vld [vmem:[%s347_s3] ss:$0 sm:$0xff] }
   0x9   :  { %205 = vmatprep.subr.mxu0 %v239_v2  ;;  %v178_v50 = vld [vmem:[%s348_s5] ss:$0 sm:$0xff] }
   0xa   :  { %206 = vmatpush3.msra.mxu0 %v89_v8  ;;  %v66_v27 = vxor.u32 %v65_v26, %v62_v25 }
   0xb   :  { %207 = vmatprep.subr.mxu0 %v239_v2 }
   0xc   :  { %208 = vmatpush3.msra.mxu0 %v88_v9  ;;  %v67_v28 = vshrl.u32 %v66_v27, 16 }
   0xd   :  { %209 = vmatprep.subr.mxu0 %v239_v2 }
   0xe   :  { %210 = vmatpush3.msra.mxu0 %v87_v10  ;;  %v68_v29 = vxor.u32 %v67_v28, %v66_v27 }
   0xf   :  { %211 = vmatprep.subr.mxu0 %v239_v2 }
  0x10   :  { %212 = vmatpush3.msra.mxu0 %v86_v11  ;;  %v69_v30 = vmul.u32 2146121005, %v68_v29 }
  0x11   :  { %213 = vmatprep.subr.mxu0 %v239_v2 }
  0x12   :  { %214 = vmatpush3.msra.mxu0 %v85_v12  ;;  %v70_v31 = vshrl.u32 %v69_v30, 15 }
  0x13   :  { %215 = vmatprep.subr.mxu0 %v239_v2 }
  0x14   :  { %216 = vmatpush3.msra.mxu0 %v84_v13  ;;  %v71_v32 = vxor.u32 %v70_v31, %v69_v30 }
  0x15   :  { %217 = vmatprep.subr.mxu0 %v239_v2 }
  0x16   :  { %218 = vmatpush3.msra.mxu0 %v83_v14  ;;  %v72_v37 = vmul.u32 2221713035, %v71_v32 }
  0x17   :  { %219 = vmatprep.subr.mxu0 %v239_v2 }
  0x18   :  { %220 = vmatpush3.msra.mxu0 %v82_v15  ;;  %v73_v41 = vshrl.u32 %v72_v37, 16 }
  0x19   :  { %221 = vmatprep.subr.mxu0 %v239_v2 }
  0x1a   :  { %222 = vmatpush3.msra.mxu0 %v81_v16  ;;  %v74_v46 = vxor.u32 %v73_v41, %v72_v37 }
  0x1b   :  { %223 = vmatprep.subr.mxu0 %v239_v2 }
  0x1c   :  { %224 = vmatpush3.msra.mxu0 %v80_v17  ;;  %vm75_vm1 = vcmp.lt.u32.totalorder %v74_v46, 2147483648 }
  0x1d   :  { %225 = vmatprep.subr.mxu0 %v239_v2 }
  0x1e   :  { %226 = vmatpush3.msra.mxu0 %v79_v18 }
  0x1f   :  { %227 = vmatprep.subr.mxu0 %v239_v2 }
  0x20   :  { %228 = vmatpush3.msra.mxu0 %v78_v19 }
  0x7d   :  { %v27_v36 = vpop.permute.xlu0 %26 }
  0x7e   :  { %v33_v42 = vmul.f32 %v32_v38, %v27_v36 }
  0x82   :  { %v36_v40 = vpop.permute.xlu0 %35 }
  0x83   :  { %v42_v43 = vmul.f32 %v41_v39, %v36_v40 }
  0x85   :  { %v43_v45 = vadd.f32 %v42_v43, %v33_v42 }
  0x87   :  { %v51_v47 = vadd.f32 %v177_v44, %v43_v45 }
  0x89   :  { %v52_v48 = vmax.f32 %v51_v47, 0.0 }
  0x8b   :  { %v76_v49 = vmul.f32 2.0, %v52_v48 }
  0x8d   :  { %230 = vmatmul.mubr.msk.f32.vlgmr.msra.gmra.mxu0 %vm75_vm1, %v76_v49 }
 0x14d   :  { %v167_v51 = vpop.f32.mrf.mxu0 }
 0x14e   :  { %v168_v52 = vadd.f32 %v178_v50, %v167_v51 }
 0x14f   :  { %v231_v53 = vpop.f32.mrf.mxu0 }
 0x150   :  { %172 = vst.msk [vmem:[%s349_s6] sm:$0xff] %vm171_vm2, %v168_v52 }

</bundles_post_ra>
